<compile_context>
chip_gen: v7x
topology: tpu7x:2x2x1
jax: 0.10.0
libtpu: 0.0.40
codegen_flags: <defaults>
</compile_context>

<pallas_src>
import jax
import jax.numpy as jnp
from jax.experimental import pallas as pl
from jax.experimental.pallas import tpu as pltpu


def _round_up(x: int, m: int) -> int:
    return (x + m - 1) // m * m


def _vmem_limit_bytes() -> int:
    """Generation-aware scoped-VMEM limit (~54 MiB on v7x, ~108 MiB on v5e/v6e)."""
    cap = 64 * 1024 * 1024  # safe fallback = v7x physical VMEM
    try:
        info = pltpu.get_tpu_info()
        cap = int(getattr(info, "vmem_capacity_bytes", cap)) or cap
    except Exception:
        pass
    return int(min(cap - (8 << 20), 0.85 * cap))


def _select_tiling(n: int, hp: int, vmem_limit: int):
    """Pick the A_hat row-tile height TM (multiple of 64) and padded size Np.

    Budget: 2 double-buffered (TM, Np) bf16 A tiles + resident P/b1/w2/out blocks + the
    (TM, Hp) f32 layer-1 intermediate must fit `vmem_limit`.  Among feasible TMs we
    minimize streamed-A bytes derated by the measured HBM-roofline efficiency (~TM/512).
    Np is a multiple of 2*TM so the two core-slots get an even number of tiles.
    """
    np0 = _round_up(n, 128)
    resident = 2 * (np0 * hp * 2)        # P (bf16), counted at 2 pipeline buffers
    resident += 2 * 2 * (hp * 4)         # b1 / w2 rows (f32)
    resident += 2 * (8 * np0 * 4)        # (8, Np) f32 per-core output block
    avail = vmem_limit - resident - (6 << 20)   # compiler-internal slack
    per_row0 = 4 * np0 + 16 * hp         # 2x bf16 A-row buffers + f32 intermediates
    tm_max = max(64, min(avail // per_row0 if avail > 0 else 64, np0 // 2))
    tm_max = max(64, (tm_max // 64) * 64)

    best = None
    for tm in range(64, tm_max + 1, 64):
        np_c = _round_up(n, 2 * tm)      # multiple of 2*TM -> even 2-core split, lane-aligned
        if tm * (4 * np_c + 16 * hp) > avail and tm > 64:
            continue                     # would overflow VMEM once Np is re-padded
        # streamed A bytes ~ np_c^2, derated by roofline efficiency (saturates ~512 rows)
        score = float(np_c) * float(np_c) * max(1.0, 512.0 / tm)
        key = (score, -tm)
        if best is None or key < best[0]:
            best = (key, tm, np_c)
    _, tm, np_pad = best
    return tm, np_pad


def gcn_kernel(a_ref, p_ref, b1_ref, w2_ref, out_ref):
    """One grid step: one (TM, Np) row tile of A_hat, accumulated into row 0 of this
    core-slot's lane-dense (8, Np) f32 output block."""
    j = pl.program_id(1)

    @pl.when(j == 0)
    def _init():
        out_ref[...] = jnp.zeros_like(out_ref)

    a = a_ref[...]                                                   # (TM, Np) bf16

    # ---- GCNConv layer 1 (this tile's rows): relu(A[R, :] @ P + b1) ------------------
    s = jnp.dot(a, p_ref[...], preferred_element_type=jnp.float32) + b1_ref[...]
    s = jnp.maximum(s, 0.0)                                          # (TM, Hp) f32

    # ---- GCNConv layer 2 projection: q^T = w2^T @ s^T (NT matmul -> lane-dense row) --
    q_row = jax.lax.dot_general(
        w2_ref[...], s,
        dimension_numbers=(((1,), (1,)), ((), ())),
        preferred_element_type=jnp.float32,
    )                                                                # (1, TM) f32

    # ---- GCNConv layer 2 aggregation, reusing the SAME A tile (A_hat == A_hat^T) -----
    out_ref[0:1, :] += jnp.dot(
        q_row.astype(jnp.bfloat16), a, preferred_element_type=jnp.float32
    )                                                                # (1, Np) f32


@jax.jit
def gcn_regressor_forward(x, edge_index, w1, b1, w2, b2):
    """x: (N, F) f32, edge_index: (2, E) int32 (undirected) -> (N,) f32."""
    n = x.shape[0]
    h = w1.shape[1]

    hp = _round_up(h, 128)
    vmem_limit = _vmem_limit_bytes()
    tm, np_pad = _select_tiling(n, hp, vmem_limit)
    tiles_per_core = np_pad // (2 * tm)

    # Dense symmetric-normalized adjacency A_hat = D^-1/2 (A + I) D^-1/2, built directly
    # at the padded size (pads stay exactly zero) so the scatter-add, self loops, scaling
    # and bf16 cast fuse under jit into as few N^2 passes as possible.  Duplicate edges
    # are summed (scatter-add message-passing semantics), matching the reference.
    src, dst = edge_index[0], edge_index[1]
    a = jnp.zeros((np_pad, np_pad), jnp.float32).at[dst, src].add(1.0)
    diag = jnp.arange(n, dtype=jnp.int32)
    a = a.at[diag, diag].add(1.0)                        # self loops on real nodes only
    deg = jnp.sum(a, axis=1)                             # padded rows: deg 0 -> dinv 0
    dinv = jnp.where(deg > 0, jax.lax.rsqrt(deg), 0.0)
    a_p = (a * dinv[:, None] * dinv[None, :]).astype(jnp.bfloat16)   # (Np, Np) bf16
    # NOTE: the fused single-pass kernel assumes A_hat == A_hat^T (undirected edge_index).

    # Hoisted layer-1 projection P = X @ W1 (tiny XLA matmul) -> resident bf16 input.
    p_p = jnp.zeros((np_pad, hp), jnp.bfloat16).at[:n, :h].set((x @ w1).astype(jnp.bfloat16))
    b1_p = jnp.pad(b1, (0, hp - h)).astype(jnp.float32).reshape(1, hp)
    w2_p = jnp.pad(w2[:, 0], (0, hp - h)).astype(jnp.float32).reshape(1, hp)

    def a_index_map(c, j):                               # core-slot c handles its half
        return (c * tiles_per_core + j, 0)

    out2 = pl.pallas_call(
        gcn_kernel,
        out_shape=jax.ShapeDtypeStruct((16, np_pad), jnp.float32),   # rows 0 / 8 used
        grid_spec=pltpu.PrefetchScalarGridSpec(
            num_scalar_prefetch=0,
            grid=(2, tiles_per_core),                    # (core-slot, A row tiles)
            in_specs=[
                pl.BlockSpec((tm, np_pad), a_index_map),            # A_hat tile (streamed)
                pl.BlockSpec((np_pad, hp), lambda c, j: (0, 0)),    # P (resident)
                pl.BlockSpec((1, hp), lambda c, j: (0, 0)),         # b1 row (f32)
                pl.BlockSpec((1, hp), lambda c, j: (0, 0)),         # w2 row (f32)
            ],
            out_specs=pl.BlockSpec((8, np_pad), lambda c, j: (c, 0)),  # per-core accumulator
        ),
        compiler_params=pltpu.CompilerParams(
            dimension_semantics=("parallel", "arbitrary"),
            vmem_limit_bytes=vmem_limit,
        ),
        cost_estimate=pl.CostEstimate(
            flops=2 * np_pad * np_pad * hp + 2 * np_pad * hp + 2 * np_pad * np_pad,
            transcendentals=0,
            bytes_accessed=2 * np_pad * np_pad + 2 * np_pad * hp + 16 * np_pad * 4 + 8 * hp,
        ),
    )(a_p, p_p, b1_p, w2_p)

    # Sum the two per-core partial rows, add the layer-2 bias (matches `x.squeeze()`).
    return out2[0, :n] + out2[8, :n] + b2[0]


def _reference(x, edge_index, w1, b1, w2, b2):
    """Pure-JAX f32 reference of the same forward pass."""
    n = x.shape[0]
    src, dst = edge_index[0], edge_index[1]
    a = jnp.zeros((n, n), jnp.float32).at[dst, src].add(1.0)
    a = a + jnp.eye(n, dtype=jnp.float32)
    deg = jnp.sum(a, axis=1)
    dinv = jnp.where(deg > 0, jax.lax.rsqrt(deg), 0.0)
    a_hat = dinv[:, None] * a * dinv[None, :]
    hmid = jnp.maximum(a_hat @ (x @ w1) + b1, 0.0)
    out = a_hat @ (hmid @ w2) + b2
    return out.squeeze()


if __name__ == "__main__":
    key = jax.random.PRNGKey(0)
    k_x, k_e, k_w1, k_b1, k_w2, k_b2 = jax.random.split(key, 6)

    # Small, forward-consistent shapes: N nodes, GCN(in=16 -> hidden=32 -> 1).
    N = 256
    in_channels = 16
    hidden_channels = 32
    num_edges = 512

    x = jax.random.normal(k_x, (N, in_channels), dtype=jnp.float32)
    e = jax.random.randint(k_e, (2, num_edges), 0, N, dtype=jnp.int32)
    # GCN graphs are undirected: include both directions (as the GraphRfi pipeline does);
    # the fused kernel relies on A_hat being symmetric.
    edge_index = jnp.concatenate([e, e[::-1]], axis=1)

    def glorot(k, fan_in, fan_out):
        lim = jnp.sqrt(6.0 / (fan_in + fan_out))
        return jax.random.uniform(k, (fan_in, fan_out), jnp.float32, -lim, lim)

    w1 = glorot(k_w1, in_channels, hidden_channels)
    b1 = 0.1 * jax.random.normal(k_b1, (hidden_channels,), dtype=jnp.float32)
    w2 = glorot(k_w2, hidden_channels, 1)
    b2 = 0.1 * jax.random.normal(k_b2, (1,), dtype=jnp.float32)

    out = jax.block_until_ready(gcn_regressor_forward(x, edge_index, w1, b1, w2, b2))
    ref = _reference(x, edge_index, w1, b1, w2, b2)

    assert out.shape == (N,), out.shape
    err = float(jnp.max(jnp.abs(out - ref)))
    # bf16 A_hat / P / q_row with f32 accumulation -> looser tolerance than pure f32.
    assert bool(jnp.allclose(out, ref, atol=5e-2, rtol=5e-2)), f"max abs err = {err}"

    print("KERNEL_OK")
</pallas_src>

<mosaic_0001>
module attributes {stable_mosaic.version = 11 : i64} {
  func.func private @main(%arg0: i32) attributes {dimension_semantics = [#tpu.dimension_semantics<core_parallel>], iteration_bounds = array<i64: 2>, tpu.core_type = #tpu.core_type<sc_scalar_subcore>, window_params = []} {
    return
  }
}

module attributes {stable_mosaic.version = 11 : i64} {
  func.func private @main(%arg0: i32) attributes {dimension_semantics = [#tpu.dimension_semantics<core_parallel>], iteration_bounds = array<i64: 2>, tpu.core_type = #tpu.core_type<sc_scalar_subcore>, window_params = []} {
    return
  }
}

module attributes {stable_mosaic.version = 11 : i64} {
  func.func @gcn_kernel(%arg0: i32, %arg1: i32, %arg2: memref<128x256xbf16, #tpu.memory_space<vmem>>, %arg3: memref<256x128xbf16, #tpu.memory_space<vmem>>, %arg4: memref<1x128xf32, #tpu.memory_space<vmem>>, %arg5: memref<1x128xf32, #tpu.memory_space<vmem>>, %arg6: memref<8x256xf32, #tpu.memory_space<vmem>>) attributes {dimension_semantics = [#tpu.dimension_semantics<parallel>, #tpu.dimension_semantics<arbitrary>], iteration_bounds = array<i64: 2, 1>, scalar_prefetch = 0 : i64, scratch_operands = 0 : i64, tpu.core_type = #tpu.core_type<tc>, window_params = [{transform_indices = @transform_0, window_bounds = array<i64: 128, 256>}, {pipeline_mode = #tpu.pipeline_mode<synchronous>, transform_indices = @transform_1, window_bounds = array<i64: 256, 128>}, {pipeline_mode = #tpu.pipeline_mode<synchronous>, transform_indices = @transform_2, window_bounds = array<i64: 1, 128>}, {pipeline_mode = #tpu.pipeline_mode<synchronous>, transform_indices = @transform_3, window_bounds = array<i64: 1, 128>}, {transform_indices = @transform_4, window_bounds = array<i64: 8, 256>}]} {
    %c0_i32 = arith.constant 0 : i32
    %0 = arith.cmpi eq, %arg1, %c0_i32 : i32
    %1 = arith.extui %0 : i1 to i32
    %c0_i32_0 = arith.constant 0 : i32
    %2 = arith.cmpi ne, %1, %c0_i32_0 : i32
    scf.if %2 {
      %cst_15 = arith.constant 0.000000e+00 : f32
      %18 = vector.broadcast %cst_15 : f32 to vector<8x256xf32>
      %c0_16 = arith.constant 0 : index
      %c0_17 = arith.constant 0 : index
      %19 = vector.load %arg6[%c0_16, %c0_17] : memref<8x256xf32, #tpu.memory_space<vmem>>, vector<8x256xf32>
      tpu.vector_store %arg6[%c0_16, %c0_17], %18 {strides = array<i32>} : memref<8x256xf32, #tpu.memory_space<vmem>>, vector<8x256xf32>,
    } else {
    }
    %c0 = arith.constant 0 : index
    %c0_1 = arith.constant 0 : index
    %3 = vector.load %arg2[%c0, %c0_1] : memref<128x256xbf16, #tpu.memory_space<vmem>>, vector<128x256xbf16>
    %c0_2 = arith.constant 0 : index
    %c0_3 = arith.constant 0 : index
    %4 = vector.load %arg3[%c0_2, %c0_3] : memref<256x128xbf16, #tpu.memory_space<vmem>>, vector<256x128xbf16>
    %cst = arith.constant dense<0.000000e+00> : vector<128x128xf32>
    %5 = tpu.matmul %3, %4, %cst {dimension_numbers = #tpu.dot_dimension_numbers<[1], [0], [0], [1], [0, 0, 1, 1], [], []>} : vector<128x256xbf16>, vector<256x128xbf16>, vector<128x128xf32> -> vector<128x128xf32>
    %c0_4 = arith.constant 0 : index
    %c0_5 = arith.constant 0 : index
    %6 = vector.load %arg4[%c0_4, %c0_5] : memref<1x128xf32, #tpu.memory_space<vmem>>, vector<1x128xf32>
    %7 = vector.broadcast %6 : vector<1x128xf32> to vector<128x128xf32>
    %8 = arith.addf %5, %7 : vector<128x128xf32>
    %cst_6 = arith.constant 0.000000e+00 : f32
    %9 = vector.broadcast %cst_6 : f32 to vector<128x128xf32>
    %10 = arith.maximumf %8, %9 : vector<128x128xf32>
    %c0_7 = arith.constant 0 : index
    %c0_8 = arith.constant 0 : index
    %11 = vector.load %arg5[%c0_7, %c0_8] : memref<1x128xf32, #tpu.memory_space<vmem>>, vector<1x128xf32>
    %cst_9 = arith.constant dense<0.000000e+00> : vector<1x128xf32>
    %12 = tpu.matmul %11, %10, %cst_9 {dimension_numbers = #tpu.dot_dimension_numbers<[1], [1], [0], [0], [0, 0, 1, 0], [], []>} : vector<1x128xf32>, vector<128x128xf32>, vector<1x128xf32> -> vector<1x128xf32>
    %c0_10 = arith.constant 0 : index
    %c0_11 = arith.constant 0 : index
    %13 = vector.load %arg6[%c0_10, %c0_11] : memref<8x256xf32, #tpu.memory_space<vmem>>, vector<1x256xf32>
    %14 = arith.truncf %12 : vector<1x128xf32> to vector<1x128xbf16>
    %cst_12 = arith.constant dense<0.000000e+00> : vector<1x256xf32>
    %15 = tpu.matmul %14, %3, %cst_12 {dimension_numbers = #tpu.dot_dimension_numbers<[1], [0], [0], [1], [0, 0, 1, 1], [], []>} : vector<1x128xbf16>, vector<128x256xbf16>, vector<1x256xf32> -> vector<1x256xf32>
    %16 = arith.addf %13, %15 : vector<1x256xf32>
    %c0_13 = arith.constant 0 : index
    %c0_14 = arith.constant 0 : index
    %17 = vector.load %arg6[%c0_13, %c0_14] : memref<8x256xf32, #tpu.memory_space<vmem>>, vector<1x256xf32>
    tpu.vector_store %arg6[%c0_13, %c0_14], %16 {strides = array<i32>} : memref<8x256xf32, #tpu.memory_space<vmem>>, vector<1x256xf32>,
    return
  }
  func.func @transform_0(%arg0: i32, %arg1: i32) -> (i32, i32) {
    %c1_i32 = arith.constant 1 : i32
    %0 = arith.muli %arg0, %c1_i32 : i32
    %1 = arith.addi %0, %arg1 : i32
    %c0_i32 = arith.constant 0 : i32
    %c0_i32_0 = arith.constant 0 : i32
    return %1, %c0_i32 : i32, i32
  }
  func.func @transform_1(%arg0: i32, %arg1: i32) -> (i32, i32) {
    %c0_i32 = arith.constant 0 : i32
    %c0_i32_0 = arith.constant 0 : i32
    %c0_i32_1 = arith.constant 0 : i32
    return %c0_i32, %c0_i32_0 : i32, i32
  }
  func.func @transform_2(%arg0: i32, %arg1: i32) -> (i32, i32) {
    %c0_i32 = arith.constant 0 : i32
    %c0_i32_0 = arith.constant 0 : i32
    %c0_i32_1 = arith.constant 0 : i32
    return %c0_i32, %c0_i32_0 : i32, i32
  }
  func.func @transform_3(%arg0: i32, %arg1: i32) -> (i32, i32) {
    %c0_i32 = arith.constant 0 : i32
    %c0_i32_0 = arith.constant 0 : i32
    %c0_i32_1 = arith.constant 0 : i32
    return %c0_i32, %c0_i32_0 : i32, i32
  }
  func.func @transform_4(%arg0: i32, %arg1: i32) -> (i32, i32) {
    %c0_i32 = arith.constant 0 : i32
    %c0_i32_0 = arith.constant 0 : i32
    return %arg0, %c0_i32 : i32, i32
  }
}

</mosaic_0001>

<bundles_post_ra>
// kernel: gcn_regressor_forward.1
= control target key start
LH: loop header
LB: loop body
LE: loop exit
PB: predicated region body
PF: predicated region fallthrough
CT: control target
= control target key end

     0   :  { %s1085_s15 = smov 0   ;;  %s1087_s16 = smov 0   ;;  %s1227_s0 = inlined_call_operand.vmem [shape: bf16[256,256], index: 0, kind: input, shape index: {}]   ;;  %s1228_s1 = inlined_call_operand.vmem [shape: bf16[256,128], index: 1, kind: input, shape index: {}]   ;;  %s1229_s2 = inlined_call_operand.vmem [shape: f32[1,128], index: 2, kind: input, shape index: {}]   ;;  %s1230_s3 = inlined_call_operand.vmem [shape: f32[1,128], index: 3, kind: input, shape index: {}]   ;;  %s1231_s4 = inlined_call_operand.vmem [shape: f32[16,256], index: 4, kind: output, shape index: {}]  }
   0x1   :  { %s1089_s17 = smov 0  }
   0x2 LB: > { %s26_s18 = sadd.s32 1, %s1049_s16  ;;  %p779_p0 = scmp.ge.s32.totalorder %s1053_s17, 1  ;;  %s1053_s17 = sphi %s1089_s17, %s14_s17   ;;  %s1049_s16 = sphi %s1087_s16, %s1233_s16   ;;  %s1045_s15 = sphi %s1085_s15, %s1232_s15  }
   0x3   : > { %p28_p1 = scmp.ge.s32.totalorder %s26_s18, 2  ;;  %p180_p2 = scmp.lt.s32.totalorder %s1053_s17, 3 }
   0x5   : > { %s1235_s18 = smov (%p28_p1, %s26_s18), 0  ;;  %p181_p3 = pnand %p779_p0, %p180_p2 }
   0x6   : > { %v991_v0 = vld [vmem:[%s1228_s1 + $0x40] sm:$0xff] (!%p181_p3)   ;;  %s780_s21 = sshll.u32 (!%p181_p3), %s1045_s15, 4  ;;  %v993_v2 = vld [vmem:[%s1228_s1 + $0x48] sm:$0xff] (!%p181_p3)   ;;  %v995_v4 = vld [vmem:[%s1228_s1 + $0x50] sm:$0xff] (!%p181_p3)   ;;  %v1055_v32 = vmov (!%p181_p3), 0.0|0.0   ;;  %p217_p5 = scmp.lt.s32.totalorder (!%p181_p3), %s1045_s15, 1 }
   0x7   : > { %184 = sbr.rel (%p181_p3) target bundleno = 761 (0x2f9), region = 36  ;;  %v992_v1 = vld [vmem:[%s1228_s1] sm:$0xff] (!%p181_p3)   ;;  %822 = vmatprep.subr.bf16.mxu1 (!%p181_p3), %v991_v0  ;;  %v994_v3 = vld [vmem:[%s1228_s1 + $0x8] sm:$0xff] (!%p181_p3)   ;;  %p210_p4 = scmp.lt.s32.totalorder (!%p181_p3), %s780_s21, 31  ;;  %v996_v5 = vld [vmem:[%s1228_s1 + $0x10] sm:$0xff] (!%p181_p3)   ;;  %vm1056_vm0 = vmmov (!%p181_p3), 0  }
   0x8   : > { %823 = vmatpush3.bf16.msra.mxu1 (!%p181_p3), %v992_v1  ;;  %v997_v6 = vld [vmem:[%s1228_s1 + $0x58] sm:$0xff] (!%p181_p3)   ;;  %v999_v8 = vld [vmem:[%s1228_s1 + $0x60] sm:$0xff] (!%p181_p3)   ;;  %v1001_v10 = vld [vmem:[%s1228_s1 + $0x68] sm:$0xff] (!%p181_p3)   ;;  %v1057_v33 = vmov (!%p181_p3), 0.0  }
   0x9   : > { %824 = vmatprep.subr.bf16.mxu1 (!%p181_p3), %v993_v2  ;;  %v998_v7 = vld [vmem:[%s1228_s1 + $0x18] sm:$0xff] (!%p181_p3)   ;;  %v1000_v9 = vld [vmem:[%s1228_s1 + $0x20] sm:$0xff] (!%p181_p3)   ;;  %v1002_v12 = vld [vmem:[%s1228_s1 + $0x28] sm:$0xff] (!%p181_p3)  }
   0xa   : > { %v1003_v13 = vld [vmem:[%s1228_s1 + $0x70] sm:$0xff] (!%p181_p3)   ;;  %v1005_v17 = vld [vmem:[%s1228_s1 + $0x78] sm:$0xff] (!%p181_p3)   ;;  %v1188_v35 = vld [vmem:[%s1229_s2] ss:$0 sm:$0xff] (!%p181_p3) }
   0xb   : > { %v1004_v16 = vld [vmem:[%s1228_s1 + $0x30] sm:$0xff] (!%p181_p3)   ;;  %v1006_v20 = vld [vmem:[%s1228_s1 + $0x38] sm:$0xff] (!%p181_p3)  }
   0xc   : > { %825 = vmatpush3.bf16.msra.mxu1 (!%p181_p3), %v994_v3 }
   0xd   : > { %826 = vmatprep.subr.bf16.mxu1 (!%p181_p3), %v995_v4 }
   0xe   : > { %s1237_s21 = smov (!%p210_p4, %s780_s21), 31  ;;  %s1239_s15 = smov (!%p217_p5, %s1045_s15), 1 }
   0xf   : > { %s820_s10 = sshll.u32 %s1237_s21, 3  ;;  %s821_s8 = sshll.u32 %s1239_s15, 4 }
  0x10   : > { %827 = vmatpush3.bf16.msra.mxu1 %v996_v5  ;;  %s1136_s19 = scalar_lea.vmem %s1227_s0, %s820_s10  ;;  %s1181_s11 = scalar_lea.vmem %s1231_s4, %s821_s8 }
  0x11   : > { %828 = vmatprep.subr.bf16.mxu1 %v997_v6  ;;  %v1009_v11 = vld [vmem:[%s1136_s19 + $0x4] ss:$8 sps:$4 sm:$0xff]   ;;  %v1007_v14 = vld [vmem:[%s1136_s19] ss:$8 sps:$4 sm:$0xff]   ;;  %v1010_v15 = vld [vmem:[%s1136_s19 + $0x14] ss:$8 sps:$4 sm:$0xff]   ;;  %227 = vst [vmem:[%s1181_s11] sm:$0xff] %v1057_v33 }
  0x12   : > { %492 = vmatprep.mubr.bf16.mxu1 %v1009_v11  ;;  %646 = vmatprep.subr.bf16.mxu0 %v1009_v11  ;;  %v1012_v18 = vld [vmem:[%s1136_s19 + $0x10] ss:$8 sps:$4 sm:$0xff]   ;;  %v1013_v19 = vld [vmem:[%s1136_s19 + $0x24] ss:$8 sps:$4 sm:$0xff]   ;;  %v1015_v21 = vld [vmem:[%s1136_s19 + $0x20] ss:$8 sps:$4 sm:$0xff]  }
  0x13   : > { %647 = vmatpush1.bf16.msra.mxu0 %v1007_v14  ;;  %v1016_v22 = vld [vmem:[%s1136_s19 + $0x34] ss:$8 sps:$4 sm:$0xff]   ;;  %v1018_v23 = vld [vmem:[%s1136_s19 + $0x30] ss:$8 sps:$4 sm:$0xff]   ;;  %v1019_v24 = vld [vmem:[%s1136_s19 + $0x44] ss:$8 sps:$4 sm:$0xff]  }
  0x14   : > { %829 = vmatpush3.bf16.msra.mxu1 %v998_v7  ;;  %648 = vmatprep.subr.bf16.mxu0 %v1010_v15  ;;  %v1021_v25 = vld [vmem:[%s1136_s19 + $0x40] ss:$8 sps:$4 sm:$0xff]   ;;  %v1022_v26 = vld [vmem:[%s1136_s19 + $0x54] ss:$8 sps:$4 sm:$0xff]   ;;  %v1024_v27 = vld [vmem:[%s1136_s19 + $0x50] ss:$8 sps:$4 sm:$0xff]  }
  0x15   : > { %830 = vmatprep.subr.bf16.mxu1 %v999_v8  ;;  %v1025_v28 = vld [vmem:[%s1136_s19 + $0x64] ss:$8 sps:$4 sm:$0xff]   ;;  %v1027_v29 = vld [vmem:[%s1136_s19 + $0x60] ss:$8 sps:$4 sm:$0xff]   ;;  %v1028_v30 = vld [vmem:[%s1136_s19 + $0x74] ss:$8 sps:$4 sm:$0xff]  }
  0x16   : > { %v1030_v31 = vld [vmem:[%s1136_s19 + $0x70] ss:$8 sps:$4 sm:$0xff]   ;;  %228 = vst [vmem:[%s1181_s11 + $0x8] sm:$0xff] %v1057_v33 }
  0x17   : > { %649 = vmatpush1.bf16.msra.mxu0 %v1012_v18 }
  0x18   : > { %831 = vmatpush3.bf16.msra.mxu1 %v1000_v9  ;;  %650 = vmatprep.subr.bf16.mxu0 %v1013_v19 }
  0x19   : > { %832 = vmatprep.subr.bf16.mxu1 %v1001_v10 }
  0x1b   : > { %651 = vmatpush1.bf16.msra.mxu0 %v1015_v21 }
  0x1c   : > { %833 = vmatpush3.bf16.msra.mxu1 %v1002_v12  ;;  %652 = vmatprep.subr.bf16.mxu0 %v1016_v22 }
  0x1d   : > { %834 = vmatprep.subr.bf16.mxu1 %v1003_v13 }
  0x1f   : > { %653 = vmatpush1.bf16.msra.mxu0 %v1018_v23 }
  0x20   : > { %835 = vmatpush3.bf16.msra.mxu1 %v1004_v16  ;;  %654 = vmatprep.subr.bf16.mxu0 %v1019_v24 }
  0x21   : > { %836 = vmatprep.subr.bf16.mxu1 %v1005_v17 }
  0x23   : > { %655 = vmatpush1.bf16.msra.mxu0 %v1021_v25 }
  0x24   : > { %837 = vmatpush3.bf16.msra.mxu1 %v1006_v20  ;;  %656 = vmatprep.subr.bf16.mxu0 %v1022_v26 }
  0x25   : > { %938 = vmatprep.subr.bf16.mxu1 %v1055_v32 }
  0x27   : > { %493 = vmatmul.mubr.bf16.vlgmr.msra.gmra.mrb[0].mxu1 %v1007_v14  ;;  %657 = vmatpush1.bf16.msra.mxu0 %v1024_v27 }
  0x28   : > { %500 = vmatprep.mubr.bf16.mxu1 %v1010_v15  ;;  %658 = vmatprep.subr.bf16.mxu0 %v1025_v28 }
  0x2b   : > { %659 = vmatpush1.bf16.msra.mxu0 %v1027_v29 }
  0x2c   : > { %660 = vmatprep.subr.bf16.mxu0 %v1028_v30 }
  0x2f   : > { %501 = vmatmul.mubr.bf16.gmra.mrb[4].mxu1 %v1012_v18  ;;  %661 = vmatpush1.bf16.msra.mxu0 %v1030_v31 }
  0x30   : > { %508 = vmatprep.mubr.bf16.mxu1 %v1013_v19 }
  0x37   : > { %509 = vmatmul.mubr.bf16.gmra.mrb[8].mxu1 %v1015_v21 }
  0x38   : > { %516 = vmatprep.mubr.bf16.mxu1 %v1016_v22 }
  0x3f   : > { %517 = vmatmul.mubr.bf16.gmra.mrb[12].mxu1 %v1018_v23 }
  0x40   : > { %524 = vmatprep.mubr.bf16.mxu1 %v1019_v24 }
  0x47   : > { %525 = vmatmul.mubr.bf16.gmra.mrb[16].mxu1 %v1021_v25 }
  0x48   : > { %532 = vmatprep.mubr.bf16.mxu1 %v1022_v26 }
  0x4f   : > { %533 = vmatmul.mubr.bf16.gmra.mrb[20].mxu1 %v1024_v27 }
  0x50   : > { %540 = vmatprep.mubr.bf16.mxu1 %v1025_v28 }
  0x57   : > { %541 = vmatmul.mubr.bf16.gmra.mrb[24].mxu1 %v1027_v29 }
  0x58   : > { %548 = vmatprep.mubr.bf16.mxu1 %v1028_v30 }
  0x5f   : > { %549 = vmatmul.mubr.bf16.gmra.mrb[28].mxu1 %v1030_v31 }
  0x60   : > { %935 = vmatprep.mubr.msk.f32.mxu1 %vm1056_vm0, %v1057_v33 }
  0xfa   : > { %v838_v34 = vpop.f32.mrb[0].mxu1 }
  0xfb   : > { %v839_v36 = vpop.f32.mrb[1].mxu1 }
  0xfc   : > { %v840_v37 = vadd.f32 %v839_v36, %v838_v34  ;;  %v841_v38 = vpop.f32.mrb[2].mxu1 }
  0xfd   : > { %v842_v39 = vpop.f32.mrb[3].mxu1 }
  0xfe   : > { %v495_v40 = vadd.f32 %v840_v37, %v1188_v35  ;;  %v843_v41 = vadd.f32 %v842_v39, %v841_v38 }
 0x100   : > { %v498_v42 = vadd.f32 %v843_v41, %v1188_v35  ;;  %v557_v43 = vmax.f32 %v495_v40, 0.0 }
 0x102   : > { %v558_v44 = vmax.f32 %v498_v42, 0.0  ;;  %v844_v45 = vpop.f32.mrb[4].mxu1 }
 0x103   : > { %v845_v46 = vpop.f32.mrb[5].mxu1 }
 0x104   : > { %v939_v47 = vpack.c.bf16 %v558_v44, %v557_v43  ;;  %v846_v48 = vadd.f32 %v845_v46, %v844_v45  ;;  %v847_v49 = vpop.f32.mrb[6].mxu1 }
 0x105   : > { %v848_v50 = vpop.f32.mrb[7].mxu1 }
 0x106   : > { %v503_v51 = vadd.f32 %v846_v48, %v1188_v35  ;;  %v849_v52 = vadd.f32 %v848_v50, %v847_v49  ;;  %940 = vmatpush3.bf16.xpose.msra.mxu1 %v939_v47 }
 0x107   : > { %941 = vmatprep.subr.bf16.mxu1 %v1055_v32 }
 0x108   : > { %v506_v53 = vadd.f32 %v849_v52, %v1188_v35  ;;  %v559_v54 = vmax.f32 %v503_v51, 0.0 }
 0x10a   : > { %v560_v55 = vmax.f32 %v506_v53, 0.0  ;;  %v850_v56 = vpop.f32.mrb[8].mxu1 }
 0x10b   : > { %v851_v57 = vpop.f32.mrb[9].mxu1 }
 0x10c   : > { %v942_v58 = vpack.c.bf16 %v560_v55, %v559_v54  ;;  %v852_v59 = vadd.f32 %v851_v57, %v850_v56  ;;  %v853_v60 = vpop.f32.mrb[10].mxu1 }
 0x10d   : > { %v854_v61 = vpop.f32.mrb[11].mxu1 }
 0x10e   : > { %v511_v62 = vadd.f32 %v852_v59, %v1188_v35  ;;  %v855_v63 = vadd.f32 %v854_v61, %v853_v60  ;;  %943 = vmatpush3.bf16.xpose.msra.mxu1 %v942_v58  ;;  %v573_v61 = vld [vmem:[%s1230_s3] sm:$0x1] }
 0x10f   : > { %944 = vmatprep.subr.bf16.mxu1 %v1055_v32 }
 0x110   : > { %v514_v0 = vadd.f32 %v855_v63, %v1188_v35  ;;  %v561_v1 = vmax.f32 %v511_v62, 0.0  ;;  %v1058_v62 = vmov 0  }
 0x111   : > { %678 = vmatprep.mubr.bf16.mxu0 %v1058_v62 }
 0x112   : > { %v562_v2 = vmax.f32 %v514_v0, 0.0  ;;  %v856_v3 = vpop.f32.mrb[12].mxu1 }
 0x113   : > { %v857_v4 = vpop.f32.mrb[13].mxu1 }
 0x114   : > { %v945_v5 = vpack.c.bf16 %v562_v2, %v561_v1  ;;  %v858_v6 = vadd.f32 %v857_v4, %v856_v3  ;;  %v859_v7 = vpop.f32.mrb[14].mxu1  ;;  %v1059_v2 = vmov 1966171168  }
 0x115   : > { %v860_v8 = vpop.f32.mrb[15].mxu1 }
 0x116   : > { %v519_v9 = vadd.f32 %v858_v6, %v1188_v35  ;;  %v861_v10 = vadd.f32 %v860_v8, %v859_v7  ;;  %946 = vmatpush3.bf16.xpose.msra.mxu1 %v945_v5 }
 0x117   : > { %947 = vmatprep.subr.bf16.mxu1 %v1055_v32 }
 0x118   : > { %v522_v11 = vadd.f32 %v861_v10, %v1188_v35  ;;  %v563_v12 = vmax.f32 %v519_v9, 0.0 }
 0x11a   : > { %v564_v13 = vmax.f32 %v522_v11, 0.0  ;;  %v862_v14 = vpop.f32.mrb[16].mxu1 }
 0x11b   : > { %v863_v15 = vpop.f32.mrb[17].mxu1 }
 0x11c   : > { %v948_v16 = vpack.c.bf16 %v564_v13, %v563_v12  ;;  %v864_v17 = vadd.f32 %v863_v15, %v862_v14  ;;  %v865_v18 = vpop.f32.mrb[18].mxu1  ;;  %v644_v12 = vld [vmem:[%s1181_s11] ss:$8 sm:$0x3] }
 0x11d   : > { %v866_v19 = vpop.f32.mrb[19].mxu1 }
 0x11e   : > { %v527_v20 = vadd.f32 %v864_v17, %v1188_v35  ;;  %v867_v21 = vadd.f32 %v866_v19, %v865_v18  ;;  %949 = vmatpush3.bf16.xpose.msra.mxu1 %v948_v16 }
 0x11f   : > { %950 = vmatprep.subr.bf16.mxu1 %v1055_v32 }
 0x120   : > { %v530_v22 = vadd.f32 %v867_v21, %v1188_v35  ;;  %v565_v23 = vmax.f32 %v527_v20, 0.0 }
 0x122   : > { %v566_v24 = vmax.f32 %v530_v22, 0.0  ;;  %v868_v25 = vpop.f32.mrb[20].mxu1 }
 0x123   : > { %v869_v26 = vpop.f32.mrb[21].mxu1 }
 0x124   : > { %v951_v27 = vpack.c.bf16 %v566_v24, %v565_v23  ;;  %v870_v28 = vadd.f32 %v869_v26, %v868_v25  ;;  %v871_v29 = vpop.f32.mrb[22].mxu1 }
 0x125   : > { %v872_v30 = vpop.f32.mrb[23].mxu1 }
 0x126   : > { %v535_v31 = vadd.f32 %v870_v28, %v1188_v35  ;;  %v873_v33 = vadd.f32 %v872_v30, %v871_v29  ;;  %952 = vmatpush3.bf16.xpose.msra.mxu1 %v951_v27 }
 0x127   : > { %953 = vmatprep.subr.bf16.mxu1 %v1055_v32 }
 0x128   : > { %v538_v34 = vadd.f32 %v873_v33, %v1188_v35  ;;  %v567_v36 = vmax.f32 %v535_v31, 0.0 }
 0x12a   : > { %v568_v37 = vmax.f32 %v538_v34, 0.0  ;;  %v874_v38 = vpop.f32.mrb[24].mxu1 }
 0x12b   : > { %v875_v39 = vpop.f32.mrb[25].mxu1 }
 0x12c   : > { %v954_v40 = vpack.c.bf16 %v568_v37, %v567_v36  ;;  %v876_v41 = vadd.f32 %v875_v39, %v874_v38  ;;  %v877_v42 = vpop.f32.mrb[26].mxu1 }
 0x12d   : > { %v878_v43 = vpop.f32.mrb[27].mxu1 }
 0x12e   : > { %v543_v44 = vadd.f32 %v876_v41, %v1188_v35  ;;  %v879_v45 = vadd.f32 %v878_v43, %v877_v42  ;;  %955 = vmatpush3.bf16.xpose.msra.mxu1 %v954_v40 }
 0x12f   : > { %956 = vmatprep.subr.bf16.mxu1 %v1055_v32 }
 0x130   : > { %v546_v46 = vadd.f32 %v879_v45, %v1188_v35  ;;  %v569_v47 = vmax.f32 %v543_v44, 0.0 }
 0x132   : > { %v570_v48 = vmax.f32 %v546_v46, 0.0  ;;  %v880_v49 = vpop.f32.mrb[28].mxu1 }
 0x133   : > { %v881_v50 = vpop.f32.mrb[29].mxu1 }
 0x134   : > { %v957_v51 = vpack.c.bf16 %v570_v48, %v569_v47  ;;  %v882_v52 = vadd.f32 %v881_v50, %v880_v49  ;;  %v883_v53 = vpop.f32.mrb[30].mxu1 }
 0x135   : > { %v884_v54 = vpop.f32.mrb[31].mxu1 }
 0x136   : > { %v551_v55 = vadd.f32 %v882_v52, %v1188_v35  ;;  %v885_v56 = vadd.f32 %v884_v54, %v883_v53  ;;  %958 = vmatpush3.bf16.xpose.msra.mxu1 %v957_v51 }
 0x137   : > { %959 = vmatprep.subr.bf16.mxu1 %v1055_v32  ;;  %v691_v32 = vunpack.c.l.s4 %v1059_v2 }
 0x138   : > { %v554_v57 = vadd.f32 %v885_v56, %v1188_v35  ;;  %v571_v58 = vmax.f32 %v551_v55, 0.0  ;;  %v693_v35 = vlaneseq }
 0x139   : > { %v692_v3 = vunpack.c.0.s8 %v691_v32 }
 0x13a   : > { %v572_v59 = vmax.f32 %v554_v57, 0.0  ;;  %v694_v4 = vshrl.u32 %v693_v35, 7  ;;  %vm708_vm1 = vcmp.lt.s32.totalorder %v693_v35, 256 }
 0x13c   : > { %v960_v60 = vpack.c.bf16 %v572_v59, %v571_v58  ;;  %v695_v6 = vsub.s32 %v692_v3, %v694_v4 }
 0x13e   : > { %961 = vmatpush3.bf16.xpose.msra.mxu1 %v960_v60 }
 0x145   : > { %936 = vmatmul.mubr.f32.vlgmr.msra.gmra.mrb[32].mxu1 %v573_v61 }
 0x218   : > { %v640_v63 = vpop.f32.mrb[32].mxu1 }
 0x219   : > { %v645_v0 = vpack.c.bf16 %v640_v63, %v640_v63  ;;  %v937_v1 = vpop.f32.mrb[33].mxu1 }
 0x21b   : > { %679 = vmatmul.mubr.bf16.vlgmr.msra.gmra.mrb[0].mxu0 %v645_v0 }
 0x2ee   : > { %v680_v5 = vpop.f32.mrb[0].mxu0 }
 0x2ef   : > { %v682_v7 = vpop.f32.mrb[1].mxu0 }
 0x2f0   : > { %v689_v8 = vcombine.low %v680_v5, %v682_v7  ;;  %v684_v9 = vpop.f32.mrb[2].mxu0 }
 0x2f1   : > { %v685_v10 = vpop.f32.mrb[3].mxu0 }
 0x2f2   : > { %v696_v11 = vrot.slane %v689_v8, %v695_v6 }
 0x2f4   : > { %v703_v13 = vrot.slane %v696_v11, %v695_v6 }
 0x2f6   : > { %v705_v14 = vadd.f32 %v703_v13, %v644_v12 }
 0x2f8   : > { %710 = vst.msk [vmem:[%s1181_s11] ss:$8 sm:$0x3] %vm708_vm1, %v705_v14 }
 0x2f9 PF: > { %s14_s17 = sadd.s32 1, %s1053_s17   ;;  %s1232_s15 = smov %s1049_s16 }
 0x2fa   : > { %p11_p6 = scmp.ge.s32.totalorder %s14_s17, 4   ;;  %s1233_s16 = smov %s1235_s18 }
 0x2fc   :  { %13 = sbr.rel (!%p11_p6) target bundleno = 2 (0x2), region = 70 }

</bundles_post_ra>
